<compile_context>
chip_gen: v5e
topology: v5e:2x2
jax: 0.10.0
libtpu: 0.0.40
codegen_flags: <defaults>
</compile_context>

<pallas_src>
import functools

import jax
import jax.numpy as jnp
from jax.experimental import pallas as pl
from jax.experimental.pallas import tpu as pltpu


def autopad(k, p=None):
    if p is None:
        p = k // 2 if isinstance(k, int) else [x // 2 for x in k]
    return p


def _round_up(x, m):
    return (x + m - 1) // m * m


def _vmem_limit(block_bytes):
    # Stay at the 32 MiB default unless the blocks genuinely need more.
    return int(min(max(block_bytes + (4 << 20), 32 << 20), 100 << 20))


# ---------------------------------------------------------------------------
# Kernel 1: flat GEMM + BN(eval) + SiLU  (k=1 path and the rare im2col
# fallback).  BN scale/bias are applied on the f32 accumulator.
# ---------------------------------------------------------------------------
def _gemm_bn_silu_kernel(x_ref, w_ref, s_ref, b_ref, o_ref):
    # x_ref: (TM, K) bf16   w_ref: (K, Cp) bf16   s_ref/b_ref: (1, Cp) f32
    y = jnp.dot(x_ref[...], w_ref[...], preferred_element_type=jnp.float32)
    y = y * s_ref[...] + b_ref[...]
    o_ref[...] = (y * jax.nn.sigmoid(y)).astype(o_ref.dtype)      # SiLU


def _gemm_bn_silu(cols, w_mat, scale_row, bias_row, out_dtype, tm):
    m, kdim = cols.shape
    cp = w_mat.shape[1]
    tm_eff = max(8, min(tm, _round_up(m, 8)))
    # Keep >=2 parallel M steps so both v7x TensorCores get work.
    if pl.cdiv(m, tm_eff) < 2 and m >= 256:
        tm_eff = _round_up(pl.cdiv(m, 2), 8)
    grid_m = pl.cdiv(m, tm_eff)     # ragged last block: Pallas masks the store

    cost = pl.CostEstimate(
        flops=2 * m * kdim * cp,
        transcendentals=m * cp,
        bytes_accessed=(m * kdim * cols.dtype.itemsize
                        + kdim * cp * w_mat.dtype.itemsize
                        + m * cp * jnp.dtype(out_dtype).itemsize),
    )
    block_bytes = (2 * tm_eff * kdim * 2 + kdim * cp * 2
                   + 2 * tm_eff * cp * jnp.dtype(out_dtype).itemsize)

    return pl.pallas_call(
        _gemm_bn_silu_kernel,
        out_shape=jax.ShapeDtypeStruct((m, cp), out_dtype),
        grid_spec=pltpu.PrefetchScalarGridSpec(
            num_scalar_prefetch=0,
            grid=(grid_m,),
            in_specs=[
                pl.BlockSpec((tm_eff, kdim), lambda i: (i, 0)),
                pl.BlockSpec((kdim, cp), lambda i: (0, 0)),
                pl.BlockSpec((1, cp), lambda i: (0, 0)),
                pl.BlockSpec((1, cp), lambda i: (0, 0)),
            ],
            out_specs=pl.BlockSpec((tm_eff, cp), lambda i: (i, 0)),
        ),
        compiler_params=pltpu.CompilerParams(
            dimension_semantics=("parallel",),
            vmem_limit_bytes=_vmem_limit(block_bytes)),
        cost_estimate=cost,
    )(cols, w_mat, scale_row, bias_row)


# ---------------------------------------------------------------------------
# Kernel 2: implicit-im2col conv for k > 1, stride 1.
# Grid = (N, Cout_blocks, Ho/TH); weights + the whole padded image of the
# current batch item are VMEM resident; kh/kw are unrolled in-kernel with a
# local f32 accumulator; bias/scale + SiLU fused in the epilogue.
# ---------------------------------------------------------------------------
def _row_conv_kernel(x_ref, w_ref, s_ref, b_ref, o_ref, *, k, th, wo):
    # x_ref: (1, Hx, Wp, Cin) bf16    w_ref: (k, k, Cin, Cpb) bf16
    # s_ref/b_ref: (1, Cpb) f32       o_ref: (1, TH, Wo, Cpb)
    cin = x_ref.shape[-1]
    cpb = o_ref.shape[-1]
    y0 = pl.program_id(2) * th
    acc = jnp.zeros((th * wo, cpb), jnp.float32)
    for i in range(k):                               # unrolled kernel rows
        slab = x_ref[0, pl.ds(y0 + i, th)]           # (TH, Wp, Cin) bf16
        for j in range(k):                           # unrolled kernel cols
            # shift the narrow bf16 operand, not the wide f32 result
            part = slab[:, j:j + wo, :].reshape(th * wo, cin)
            acc = acc + jnp.dot(part, w_ref[i, j],
                                preferred_element_type=jnp.float32)
    y = acc * s_ref[...] + b_ref[...]                # BN (eval) on f32 accum
    o_ref[0] = (y * jax.nn.sigmoid(y)).astype(o_ref.dtype).reshape(th, wo, cpb)


def _conv_rows(x_nhwc, weight, scale_row, bias_row, k, pad, out_dtype,
               compute_dtype, th, cout_block):
    n, h, w, c_in = x_nhwc.shape
    c_out = weight.shape[0]
    cp = scale_row.shape[1]
    hp, wp = h + 2 * pad, w + 2 * pad
    ho, wo = hp - k + 1, wp - k + 1

    th = max(1, min(th, ho))
    ho_pad = _round_up(ho, th)
    extra = ho_pad - ho                 # pad bottom rows so all reads in-bounds

    # Cout block: multiple of 128, divides cp, <= cout_block (bounds weight VMEM).
    q = cp // 128
    rmax = max(1, min(q, cout_block // 128))
    r = 1
    for cand in range(rmax, 0, -1):
        if q % cand == 0:
            r = cand
            break
    cpb = 128 * r
    n_co = cp // cpb

    x_pad = jnp.pad(x_nhwc, ((0, 0), (pad, pad + extra), (pad, pad), (0, 0)))
    x_pad = x_pad.astype(compute_dtype)
    hx = x_pad.shape[1]

    # (C_out, C_in, kh, kw) -> (kh, kw, C_in, Cp), channel-padded, bf16.
    w_k = jnp.transpose(weight, (2, 3, 1, 0))
    w_k = jnp.pad(w_k, ((0, 0), (0, 0), (0, 0), (0, cp - c_out)))
    w_k = w_k.astype(compute_dtype)

    kernel = functools.partial(_row_conv_kernel, k=k, th=th, wo=wo)
    cost = pl.CostEstimate(
        flops=2 * n * ho * wo * k * k * c_in * cp,
        transcendentals=n * ho * wo * cp,
        bytes_accessed=(n * hx * wp * c_in * 2 + k * k * c_in * cp * 2
                        + n * ho * wo * cp * jnp.dtype(out_dtype).itemsize),
    )
    block_bytes = (2 * hx * wp * c_in * 2                  # image (dbl buffer)
                   + 2 * k * k * c_in * cpb * 2            # resident weights
                   + 2 * th * wo * cpb * jnp.dtype(out_dtype).itemsize
                   + th * wo * cpb * 4)                    # f32 accumulator

    out = pl.pallas_call(
        kernel,
        out_shape=jax.ShapeDtypeStruct((n, ho, wo, cp), out_dtype),
        grid_spec=pltpu.PrefetchScalarGridSpec(
            num_scalar_prefetch=0,
            grid=(n, n_co, ho_pad // th),
            in_specs=[
                # whole padded image of the current batch item; constant block
                # index along cout/row axes -> fetched once per batch item.
                pl.BlockSpec((1, hx, wp, c_in), lambda b, c, y: (b, 0, 0, 0)),
                # full folded weights for the current cout block; constant
                # across the row axis -> never re-DMA'd per step.
                pl.BlockSpec((k, k, c_in, cpb), lambda b, c, y: (0, 0, 0, c)),
                pl.BlockSpec((1, cpb), lambda b, c, y: (0, c)),
                pl.BlockSpec((1, cpb), lambda b, c, y: (0, c)),
            ],
            out_specs=pl.BlockSpec((1, th, wo, cpb),
                                   lambda b, c, y: (b, y, 0, c)),
        ),
        compiler_params=pltpu.CompilerParams(
            dimension_semantics=("parallel", "parallel", "parallel"),
            vmem_limit_bytes=_vmem_limit(block_bytes)),
        cost_estimate=cost,
    )(x_pad, w_k, scale_row, bias_row)
    return out


# ---------------------------------------------------------------------------
# Fallback im2col (only for k > 1 AND stride != 1, rare in this module).
# ---------------------------------------------------------------------------
def _im2col_nhwc(x_nhwc, kh, kw, stride, pad):
    x = jnp.pad(x_nhwc, ((0, 0), (pad, pad), (pad, pad), (0, 0)))
    n, hp, wp, c = x.shape
    ho = (hp - kh) // stride + 1
    wo = (wp - kw) // stride + 1
    patches = []
    for i in range(kh):
        for j in range(kw):
            patches.append(
                x[:, i:i + (ho - 1) * stride + 1:stride,
                     j:j + (wo - 1) * stride + 1:stride, :])
    cols = jnp.concatenate(patches, axis=-1)          # (N, Ho, Wo, kh*kw*C)
    return cols.reshape(n * ho * wo, kh * kw * c), ho, wo


# ---------------------------------------------------------------------------
# Public wrapper: Conv = Conv2d(bias=False) -> BatchNorm2d(eval) -> SiLU.
# ---------------------------------------------------------------------------
@functools.partial(jax.jit, static_argnames=("k", "s", "p", "eps", "tm", "th",
                                             "cout_block", "out_dtype"))
def conv_bn_silu(x_nchw, weight, gamma, beta, run_mean, run_var, *,
                 k=1, s=1, p=None, eps=1e-3, tm=1024, th=8,
                 cout_block=512, out_dtype=jnp.bfloat16):
    """x_nchw: (N, C_in, H, W); weight: (C_out, C_in, k, k) (torch layout)."""
    pad = autopad(k, p)
    n, c_in, h, w = x_nchw.shape
    c_out = weight.shape[0]
    cp = _round_up(c_out, 128)             # lane-dense padded output channels
    compute_dtype = jnp.bfloat16

    # Eval-mode BN: y = conv(x) * scale + bias.  Applied on the f32 accumulator
    # inside the kernels (not folded into bf16 weights) for better precision.
    scale = (gamma / jnp.sqrt(run_var + eps)).astype(jnp.float32)
    bias = (beta - run_mean * scale).astype(jnp.float32)
    scale_row = jnp.pad(scale, (0, cp - c_out)).reshape(1, cp)
    bias_row = jnp.pad(bias, (0, cp - c_out)).reshape(1, cp)

    x_nhwc = jnp.transpose(x_nchw, (0, 2, 3, 1))

    if k == 1:
        # 1x1 conv: one flat GEMM over (N*Ho*Wo, C_in).  (pad-then-stride
        # matches conv_general_dilated: x_pad[o*s] == x[o*s - p].)
        x_s = x_nhwc
        if pad:
            x_s = jnp.pad(x_s, ((0, 0), (pad, pad), (pad, pad), (0, 0)))
        if s != 1:
            x_s = x_s[:, ::s, ::s, :]
        nb, ho, wo, _ = x_s.shape
        cols = x_s.reshape(nb * ho * wo, c_in).astype(compute_dtype)
        w_mat = jnp.transpose(weight, (2, 3, 1, 0)).reshape(c_in, c_out)
        w_mat = jnp.pad(w_mat, ((0, 0), (0, cp - c_out))).astype(compute_dtype)
        out_flat = _gemm_bn_silu(cols, w_mat, scale_row, bias_row, out_dtype, tm)
        out_nhwc = out_flat.reshape(nb, ho, wo, cp)
    elif s == 1:
        # k x k conv, stride 1: implicit-im2col row-tile kernel.
        out_nhwc = _conv_rows(x_nhwc, weight, scale_row, bias_row, k, pad,
                              out_dtype, compute_dtype, th, cout_block)
    else:
        # TODO(synk): fold k>1 & s>1 into the row kernel (strided pl.ds).
        cols, ho, wo = _im2col_nhwc(x_nhwc, k, k, s, pad)
        kdim = cols.shape[1]
        cols = cols.astype(compute_dtype)
        w_mat = jnp.transpose(weight, (2, 3, 1, 0)).reshape(kdim, c_out)
        w_mat = jnp.pad(w_mat, ((0, 0), (0, cp - c_out))).astype(compute_dtype)
        out_flat = _gemm_bn_silu(cols, w_mat, scale_row, bias_row, out_dtype, tm)
        out_nhwc = out_flat.reshape(n, ho, wo, cp)

    if cp != c_out:
        out_nhwc = out_nhwc[..., :c_out]
    # NCHW only to match the module interface; keep NHWC inside a network.
    return jnp.transpose(out_nhwc, (0, 3, 1, 2))


def _reference(x_nchw, weight, gamma, beta, run_mean, run_var, k, s, p, eps=1e-3):
    pad = autopad(k, p)
    y = jax.lax.conv_general_dilated(
        x_nchw, weight, window_strides=(s, s),
        padding=[(pad, pad), (pad, pad)],
        dimension_numbers=("NCHW", "OIHW", "NCHW"))
    scale = gamma / jnp.sqrt(run_var + eps)
    bias = beta - run_mean * scale
    y = y * scale[None, :, None, None] + bias[None, :, None, None]
    return y * jax.nn.sigmoid(y)


if __name__ == "__main__":
    key = jax.random.PRNGKey(0)
    n, c1, c2, h, w = 2, 4, 8, 16, 16

    kx, kw1, kw3, kg, kb, km, kv = jax.random.split(key, 7)
    x = jax.random.normal(kx, (n, c1, h, w), dtype=jnp.float32)

    gamma = 1.0 + 0.1 * jax.random.normal(kg, (c2,), dtype=jnp.float32)
    beta = 0.1 * jax.random.normal(kb, (c2,), dtype=jnp.float32)
    run_mean = 0.1 * jax.random.normal(km, (c2,), dtype=jnp.float32)
    run_var = jnp.abs(1.0 + 0.1 * jax.random.normal(kv, (c2,), dtype=jnp.float32))

    ok = True
    for k, s in ((1, 1), (3, 1), (3, 2)):
        wkey = kw1 if k == 1 else kw3
        weight = 0.1 * jax.random.normal(wkey, (c2, c1, k, k), dtype=jnp.float32)
        out = conv_bn_silu(x, weight, gamma, beta, run_mean, run_var, k=k, s=s)
        out = jax.block_until_ready(out)
        ref = _reference(x, weight, gamma, beta, run_mean, run_var, k, s, None)
        ok &= (out.shape == ref.shape)
        # bf16 GEMM operands + bf16 output with f32 accumulation.
        ok &= bool(jnp.allclose(out.astype(jnp.float32), ref,
                                atol=3e-2, rtol=3e-2))

    print("KERNEL_OK" if ok else "MISMATCH")
</pallas_src>

<mosaic_0001>
module attributes {stable_mosaic.version = 11 : i64} {
  func.func @_gemm_bn_silu_kernel(%arg0: i32, %arg1: memref<256x4xbf16, #tpu.memory_space<vmem>>, %arg2: memref<4x128xbf16, #tpu.memory_space<vmem>>, %arg3: memref<1x128xf32, #tpu.memory_space<vmem>>, %arg4: memref<1x128xf32, #tpu.memory_space<vmem>>, %arg5: memref<256x128xbf16, #tpu.memory_space<vmem>>) attributes {dimension_semantics = [#tpu.dimension_semantics<parallel>], iteration_bounds = array<i64: 2>, scalar_prefetch = 0 : i64, scratch_operands = 0 : i64, tpu.core_type = #tpu.core_type<tc>, window_params = [{transform_indices = @transform_0, window_bounds = array<i64: 256, 4>}, {pipeline_mode = #tpu.pipeline_mode<synchronous>, transform_indices = @transform_1, window_bounds = array<i64: 4, 128>}, {pipeline_mode = #tpu.pipeline_mode<synchronous>, transform_indices = @transform_2, window_bounds = array<i64: 1, 128>}, {pipeline_mode = #tpu.pipeline_mode<synchronous>, transform_indices = @transform_3, window_bounds = array<i64: 1, 128>}, {transform_indices = @transform_4, window_bounds = array<i64: 256, 128>}]} {
    %c0 = arith.constant 0 : index
    %c0_0 = arith.constant 0 : index
    %0 = vector.load %arg1[%c0, %c0_0] : memref<256x4xbf16, #tpu.memory_space<vmem>>, vector<256x4xbf16>
    %c0_1 = arith.constant 0 : index
    %c0_2 = arith.constant 0 : index
    %1 = vector.load %arg2[%c0_1, %c0_2] : memref<4x128xbf16, #tpu.memory_space<vmem>>, vector<4x128xbf16>
    %cst = arith.constant dense<0.000000e+00> : vector<256x128xf32>
    %2 = tpu.matmul %0, %1, %cst {dimension_numbers = #tpu.dot_dimension_numbers<[1], [0], [0], [1], [0, 0, 1, 1], [], []>} : vector<256x4xbf16>, vector<4x128xbf16>, vector<256x128xf32> -> vector<256x128xf32>
    %c0_3 = arith.constant 0 : index
    %c0_4 = arith.constant 0 : index
    %3 = vector.load %arg3[%c0_3, %c0_4] : memref<1x128xf32, #tpu.memory_space<vmem>>, vector<1x128xf32>
    %4 = vector.broadcast %3 : vector<1x128xf32> to vector<256x128xf32>
    %5 = arith.mulf %2, %4 : vector<256x128xf32>
    %c0_5 = arith.constant 0 : index
    %c0_6 = arith.constant 0 : index
    %6 = vector.load %arg4[%c0_5, %c0_6] : memref<1x128xf32, #tpu.memory_space<vmem>>, vector<1x128xf32>
    %7 = vector.broadcast %6 : vector<1x128xf32> to vector<256x128xf32>
    %8 = arith.addf %5, %7 : vector<256x128xf32>
    %9 = arith.negf %8 : vector<256x128xf32>
    %10 = math.exp %9 : vector<256x128xf32>
    %cst_7 = arith.constant 1.000000e+00 : f32
    %11 = vector.broadcast %cst_7 : f32 to vector<256x128xf32>
    %12 = arith.addf %11, %10 : vector<256x128xf32>
    %13 = arith.divf %11, %12 : vector<256x128xf32>
    %14 = arith.mulf %8, %13 : vector<256x128xf32>
    %15 = arith.truncf %14 : vector<256x128xf32> to vector<256x128xbf16>
    %c0_8 = arith.constant 0 : index
    %c0_9 = arith.constant 0 : index
    %16 = vector.load %arg5[%c0_8, %c0_9] : memref<256x128xbf16, #tpu.memory_space<vmem>>, vector<256x128xbf16>
    tpu.vector_store %arg5[%c0_8, %c0_9], %15 {strides = array<i32>} : memref<256x128xbf16, #tpu.memory_space<vmem>>, vector<256x128xbf16>,
    return
  }
  func.func @transform_0(%arg0: i32) -> (i32, i32) {
    %c0_i32 = arith.constant 0 : i32
    %c0_i32_0 = arith.constant 0 : i32
    return %arg0, %c0_i32 : i32, i32
  }
  func.func @transform_1(%arg0: i32) -> (i32, i32) {
    %c0_i32 = arith.constant 0 : i32
    %c0_i32_0 = arith.constant 0 : i32
    %c0_i32_1 = arith.constant 0 : i32
    return %c0_i32, %c0_i32_0 : i32, i32
  }
  func.func @transform_2(%arg0: i32) -> (i32, i32) {
    %c0_i32 = arith.constant 0 : i32
    %c0_i32_0 = arith.constant 0 : i32
    %c0_i32_1 = arith.constant 0 : i32
    return %c0_i32, %c0_i32_0 : i32, i32
  }
  func.func @transform_3(%arg0: i32) -> (i32, i32) {
    %c0_i32 = arith.constant 0 : i32
    %c0_i32_0 = arith.constant 0 : i32
    %c0_i32_1 = arith.constant 0 : i32
    return %c0_i32, %c0_i32_0 : i32, i32
  }
  func.func @transform_4(%arg0: i32) -> (i32, i32) {
    %c0_i32 = arith.constant 0 : i32
    %c0_i32_0 = arith.constant 0 : i32
    return %arg0, %c0_i32 : i32, i32
  }
}

</mosaic_0001>

<bundles_post_ra>
// kernel: conv_bn_silu.1
= control target key start
LH: loop header
LB: loop body
LE: loop exit
PB: predicated region body
PF: predicated region fallthrough
CT: control target
= control target key end

     0   :  { %s1699_s15 = smov 0   ;;  %s2654_s0 = inlined_call_operand.vmem [shape: bf16[512,4], index: 0, kind: input, shape index: {}]   ;;  %s2655_s1 = inlined_call_operand.vmem [shape: bf16[4,128], index: 1, kind: input, shape index: {}]   ;;  %s2656_s2 = inlined_call_operand.vmem [shape: f32[1,128], index: 2, kind: input, shape index: {}]   ;;  %s2657_s3 = inlined_call_operand.vmem [shape: f32[1,128], index: 3, kind: input, shape index: {}]   ;;  %s2658_s4 = inlined_call_operand.vmem [shape: bf16[512,128], index: 4, kind: output, shape index: {}]  }
   0x1 LB: > { %s1289_s16 = sadd.s32 4294967295, %s1672_s15   ;;  %p1293_p0 = scmp.ge.s32.totalorder %s1672_s15, 1  ;;  %s1672_s15 = sphi %s1699_s15, %s14_s15  }
   0x2   : > { %p163_p1 = scmp.lt.s32.totalorder %s1672_s15, 3 }
   0x4   : > { %p164_p2 = pnand %p1293_p0, %p163_p1 }
   0x5   : > { %s1294_s19 = sshll.u32 (!%p164_p2), %s1289_s16, 5 }
   0x6   : > { %167 = sbr.rel (%p164_p2) target bundleno = 313 (0x139), region = 36  ;;  %p190_p3 = scmp.lt.s32.totalorder (!%p164_p2), %s1294_s19, 63 }
   0xb   : > { %v234_v0 = vld [vmem:[%s2655_s1] sm:$0x3]  ;;  %vm364_vm0 = vcmask 1041408   ;;  %s2740_s19 = smov (!%p190_p3, %s1294_s19), 63  ;;  %vm315_vm1 = vcmask 31744  }
   0xc   : > { %v366_v1 = vsel %vm364_vm0, %v234_v0, 0  ;;  %s1295_s20 = sshll.u32 %s2740_s19, 2  ;;  %v1737_v18 = vld [vmem:[%s2656_s2] ss:$0 sm:$0xff] }
   0xd   : > { %375 = vmatpush.bf16.msra.mxu0 %v366_v1  ;;  %1523 = vmatpush.bf16.msra.mxu1 %v366_v1  ;;  %s193_s23 = scalar_lea.vmem %s2654_s0, %s1295_s20  ;;  %v1742_v19 = vld [vmem:[%s2657_s3] ss:$0 sm:$0xff]  ;;  %s1963_s30 = scalar_lea.vmem %s2658_s4, %s1295_s20 }
   0xe   : > { %1524 = vmatpush.bf16.msra.mxu2 %v366_v1  ;;  %1525 = vmatpush.bf16.msra.mxu3 %v366_v1  ;;  %v1412_v2 = vld [vmem:[%s193_s23] sm:$0xff]  ;;  %v1413_v6 = vld [vmem:[%s193_s23 + $0x8] sm:$0xff]  ;;  %v1414_v10 = vld [vmem:[%s193_s23 + $0x10] sm:$0xff] }
   0xf   : > { %v1416_v3 = vld [vmem:[%s193_s23 + $0x20] sm:$0xff]  ;;  %v1417_v7 = vld [vmem:[%s193_s23 + $0x28] sm:$0xff]  ;;  %v1418_v11 = vld [vmem:[%s193_s23 + $0x30] sm:$0xff] }
  0x10   : > { %v1420_v4 = vld [vmem:[%s193_s23 + $0x40] sm:$0xff]  ;;  %1362 = vmatmul.msk.bf16.vlgmr.msra.gmra.mxu0 %vm315_vm1, %v1412_v2  ;;  %1366 = vmatmul.msk.bf16.vlgmr.msra.gmra.mxu1 %vm315_vm1, %v1416_v3  ;;  %v1421_v8 = vld [vmem:[%s193_s23 + $0x48] sm:$0xff]  ;;  %v1422_v12 = vld [vmem:[%s193_s23 + $0x50] sm:$0xff] }
  0x11   : > { %v1424_v5 = vld [vmem:[%s193_s23 + $0x60] sm:$0xff]  ;;  %1370 = vmatmul.msk.bf16.vlgmr.msra.gmra.mxu2 %vm315_vm1, %v1420_v4  ;;  %v1425_v9 = vld [vmem:[%s193_s23 + $0x68] sm:$0xff]  ;;  %v1426_v13 = vld [vmem:[%s193_s23 + $0x70] sm:$0xff] }
  0x12   : > { %1374 = vmatmul.msk.bf16.vlgmr.msra.gmra.mxu3 %vm315_vm1, %v1424_v5  ;;  %v1415_v14 = vld [vmem:[%s193_s23 + $0x18] sm:$0xff] }
  0x13   : > { %v1419_v15 = vld [vmem:[%s193_s23 + $0x38] sm:$0xff] }
  0x14   : > { %v1423_v16 = vld [vmem:[%s193_s23 + $0x58] sm:$0xff] }
  0x15   : > { %v1427_v17 = vld [vmem:[%s193_s23 + $0x78] sm:$0xff] }
  0x20   : > { %1363 = vmatmul.msk.bf16.gmra.mxu0 %vm315_vm1, %v1413_v6  ;;  %1367 = vmatmul.msk.bf16.gmra.mxu1 %vm315_vm1, %v1417_v7 }
  0x21   : > { %1371 = vmatmul.msk.bf16.gmra.mxu2 %vm315_vm1, %v1421_v8 }
  0x22   : > { %1375 = vmatmul.msk.bf16.gmra.mxu3 %vm315_vm1, %v1425_v9 }
  0x30   : > { %1364 = vmatmul.msk.bf16.gmra.mxu0 %vm315_vm1, %v1414_v10  ;;  %1368 = vmatmul.msk.bf16.gmra.mxu1 %vm315_vm1, %v1418_v11 }
  0x31   : > { %1372 = vmatmul.msk.bf16.gmra.mxu2 %vm315_vm1, %v1422_v12 }
  0x32   : > { %1376 = vmatmul.msk.bf16.gmra.mxu3 %vm315_vm1, %v1426_v13 }
  0x40   : > { %1365 = vmatmul.msk.bf16.gmra.mxu0 %vm315_vm1, %v1415_v14  ;;  %1369 = vmatmul.msk.bf16.gmra.mxu1 %vm315_vm1, %v1419_v15 }
  0x41   : > { %1373 = vmatmul.msk.bf16.gmra.mxu2 %vm315_vm1, %v1423_v16 }
  0x42   : > { %1377 = vmatmul.msk.bf16.gmra.mxu3 %vm315_vm1, %v1427_v17 }
  0x8d   : > { %v377_v20 = vpop.f32.mrf.mxu0  ;;  %v397_v21 = vpop.f32.mrf.mxu1 }
  0x8e   : > { %v461_v22 = vmul.f32 %v1737_v18, %v377_v20  ;;  %v469_v23 = vmul.f32 %v1737_v18, %v397_v21 }
  0x90   : > { %v1747_v24 = vadd.f32 %v1742_v19, %v461_v22  ;;  %v1750_v25 = vadd.f32 %v1742_v19, %v469_v23 }
  0x92   : > { %v1378_v26 = vmul.f32 -1.442695, %v1747_v24  ;;  %v1386_v27 = vmul.f32 -1.442695, %v1750_v25 }
  0x94   : > { %1536 = vpow2.f32 %v1378_v26  ;;  %v417_v28 = vpop.f32.mrf.mxu2 }
  0x95   : > { %v437_v29 = vpop.f32.mrf.mxu3  ;;  %1538 = vpow2.f32 %v1386_v27  ;;  %v477_v30 = vmul.f32 %v1737_v18, %v417_v28  ;;  %v379_v32 = vpop.f32.mrf.mxu0 }
  0x96   : > { %v485_v31 = vmul.f32 %v1737_v18, %v437_v29  ;;  %v399_v33 = vpop.f32.mrf.mxu1  ;;  %v462_v34 = vmul.f32 %v1737_v18, %v379_v32 }
  0x97   : > { %v470_v35 = vmul.f32 %v1737_v18, %v399_v33  ;;  %v1759_v36 = vadd.f32 %v1742_v19, %v477_v30 }
  0x98   : > { %v1762_v37 = vadd.f32 %v1742_v19, %v485_v31  ;;  %v1765_v38 = vadd.f32 %v1742_v19, %v462_v34 }
  0x99   : > { %v1768_v39 = vadd.f32 %v1742_v19, %v470_v35  ;;  %v1394_v40 = vmul.f32 -1.442695, %v1759_v36 }
  0x9a   : > { %v1402_v41 = vmul.f32 -1.442695, %v1762_v37  ;;  %v1537_v42 = vpop.eup %1536  ;;  %v1379_v45 = vmul.f32 -1.442695, %v1765_v38 }
  0x9b   : > { %v1539_v43 = vpop.eup %1538  ;;  %v1772_v44 = vadd.f32 1.0, %v1537_v42  ;;  %1540 = vpow2.f32 %v1394_v40  ;;  %v1387_v47 = vmul.f32 -1.442695, %v1768_v39 }
  0x9c   : > { %v1775_v46 = vadd.f32 1.0, %v1539_v43  ;;  %1542 = vpow2.f32 %v1402_v41  ;;  %v419_v48 = vpop.f32.mrf.mxu2 }
  0x9d   : > { %1544 = vrcp.f32 %v1772_v44  ;;  %v478_v49 = vmul.f32 %v1737_v18, %v419_v48  ;;  %v439_v52 = vpop.f32.mrf.mxu3  ;;  %v668_v56 = vand.u32 2147483648, %v1772_v44  ;;  %v666_v60 = vand.u32 2147483647, %v1772_v44  ;;  %v382_v62 = vpop.f32.mrf.mxu0 }
  0x9e   : > { %1546 = vrcp.f32 %v1775_v46  ;;  %v486_v61 = vmul.f32 %v1737_v18, %v439_v52  ;;  %v402_v63 = vpop.f32.mrf.mxu1  ;;  %vm662_vm2 = vweird.f32 %v1772_v44  ;;  %v788_v2 = vand.u32 2147483648, %v1775_v46 }
  0x9f   : > { %1548 = vpow2.f32 %v1379_v45  ;;  %v1782_v51 = vadd.f32 %v1742_v19, %v478_v49  ;;  %vm782_vm3 = vweird.f32 %v1775_v46  ;;  %v786_v6 = vand.u32 2147483647, %v1775_v46 }
  0xa0   : > { %1550 = vpow2.f32 %v1387_v47  ;;  %v669_v7 = vor.u32 1.1754944e-38, %v668_v56  ;;  %v463_v9 = vmul.f32 %v1737_v18, %v382_v62  ;;  %v471_v10 = vmul.f32 %v1737_v18, %v402_v63 }
  0xa1   : > { %v1541_v50 = vpop.eup %1540  ;;  %v1395_v3 = vmul.f32 -1.442695, %v1782_v51  ;;  %vm1809_vm4 = vcmp.eq.f32.partialorder %v666_v60, 8.507059e+37  ;;  %v1818_v15 = vadd.f32 %v1742_v19, %v486_v61  ;;  %v789_v17 = vor.u32 1.1754944e-38, %v788_v2 }
  0xa2   : > { %v1543_v53 = vpop.eup %1542  ;;  %v1784_v54 = vadd.f32 1.0, %v1541_v50  ;;  %vm1825_vm6 = vcmp.eq.f32.partialorder %v786_v6, 8.507059e+37  ;;  %v1836_v29 = vadd.f32 %v1742_v19, %v463_v9  ;;  %v1839_v30 = vadd.f32 %v1742_v19, %v471_v10 }
  0xa3   : > { %v1786_v55 = vpop.eup %1544  ;;  %v1789_v57 = vadd.f32 1.0, %v1543_v53  ;;  %v1403_v33 = vmul.f32 -1.442695, %v1818_v15 }
  0xa4   : > { %v1791_v58 = vpop.eup %1546  ;;  %v658_v59 = vmul.f32 %v1786_v55, %v1772_v44  ;;  %1552 = vrcp.f32 %v1784_v54  ;;  %vm663_vm5 = vweird.f32 %v1786_v55  ;;  %v908_v23 = vand.u32 2147483648, %v1784_v54 }
  0xa5   : > { %v1549_v0 = vpop.eup %1548  ;;  %v778_v1 = vmul.f32 %v1791_v58, %v1775_v46  ;;  %1554 = vrcp.f32 %v1789_v57  ;;  %v1028_v26 = vand.u32 2147483648, %v1789_v57  ;;  %v906_v28 = vand.u32 2147483647, %v1784_v54  ;;  %vm1851_vm8 = vmor %vm662_vm2, %vm663_vm5  ;;  %v384_v34 = vpop.f32.mrf.mxu0 }
  0xa6   : > { %v1551_v4 = vpop.eup %1550  ;;  %v659_v5 = vsub.f32 1.0, %v658_v59  ;;  %v1813_v13 = vadd.f32 1.0, %v1549_v0  ;;  %1556 = vpow2.f32 %v1395_v3  ;;  %vm783_vm7 = vweird.f32 %v1791_v58 }
  0xa7   : > { %v779_v8 = vsub.f32 1.0, %v778_v1  ;;  %v1815_v14 = vadd.f32 1.0, %v1551_v4  ;;  %vm902_vm9 = vweird.f32 %v1784_v54  ;;  %v909_v43 = vor.u32 1.1754944e-38, %v908_v23  ;;  %vm1867_vm10 = vmor %vm782_vm3, %vm783_vm7 }
  0xa8   : > { %v660_v11 = vmul.f32 %v1786_v55, %v659_v5  ;;  %1558 = vrcp.f32 %v1813_v13  ;;  %v681_v41 = vand.u32 2147483647, %v1813_v13  ;;  %v1026_v45 = vand.u32 2147483647, %v1789_v57  ;;  %v422_v5 = vpop.f32.mrf.mxu2 }
  0xa9   : > { %v780_v16 = vmul.f32 %v1791_v58, %v779_v8  ;;  %1560 = vrcp.f32 %v1815_v14  ;;  %v1863_v44 = vor.u32 1.1754944e-38, %v1028_v26  ;;  %vm1873_vm12 = vcmp.eq.f32.partialorder %v906_v28, 8.507059e+37  ;;  %v442_v26 = vpop.f32.mrf.mxu3 }
  0xaa   : > { %v1822_v20 = vpop.eup %1552  ;;  %v661_v21 = vadd.f32 %v1786_v55, %v660_v11  ;;  %vm677_vm13 = vweird.f32 %v1813_v13  ;;  %v683_v52 = vand.u32 2147483648, %v1813_v13  ;;  %1562 = vpow2.f32 %v1403_v33 }
  0xab   : > { %v898_v27 = vmul.f32 %v1822_v20, %v1784_v54  ;;  %v1841_v31 = vpop.eup %1554  ;;  %v781_v32 = vadd.f32 %v1791_v58, %v780_v16  ;;  %vm903_vm11 = vweird.f32 %v1822_v20  ;;  %vm1888_vm14 = vcmp.eq.f32.partialorder %v681_v41, 8.507059e+37 }
  0xac   : > { %v1018_v40 = vmul.f32 %v1841_v31, %v1789_v57  ;;  %v665_v42 = vsel %vm1851_vm8, %v1786_v55, %v661_v21  ;;  %v1557_v47 = vpop.eup %1556  ;;  %vm1022_vm15 = vweird.f32 %v1789_v57  ;;  %v803_v0 = vand.u32 2147483648, %v1815_v14  ;;  %vm1906_vm1 = vmor %vm902_vm9, %vm903_vm11 }
  0xad   : > { %v899_v35 = vsub.f32 1.0, %v898_v27  ;;  %v785_v46 = vsel %vm1867_vm10, %v1791_v58, %v781_v32  ;;  %v1882_v56 = vadd.f32 1.0, %v1557_v47  ;;  %v670_v59 = vsel %vm1809_vm4, %v669_v7, %v665_v42 }
  0xae   : > { %v1559_v53 = vpop.eup %1558  ;;  %v1019_v55 = vsub.f32 1.0, %v1018_v40  ;;  %v801_v58 = vand.u32 2147483647, %v1815_v14  ;;  %v1380_v1 = vmul.f32 -1.442695, %v1836_v29  ;;  %v790_v2 = vsel %vm1825_vm6, %v789_v17, %v785_v46 }
  0xaf   : > { %v900_v49 = vmul.f32 %v1822_v20, %v899_v35  ;;  %v673_v61 = vmul.f32 %v1559_v53, %v1813_v13  ;;  %v1561_v63 = vpop.eup %1560  ;;  %1564 = vrcp.f32 %v1882_v56  ;;  %vm797_vm0 = vweird.f32 %v1815_v14 }
  0xb0   : > { %v793_v4 = vmul.f32 %v1561_v63, %v1815_v14  ;;  %v1137_v6 = vmul.f32 %v670_v59, %v1747_v24  ;;  %v1020_v8 = vmul.f32 %v1841_v31, %v1019_v55  ;;  %vm1023_vm2 = vweird.f32 %v1841_v31  ;;  %v1563_v12 = vpop.eup %1562 }
  0xb1   : > { %v901_v60 = vadd.f32 %v1822_v20, %v900_v49  ;;  %v674_v3 = vsub.f32 1.0, %v673_v61  ;;  %v684_v9 = vor.u32 1.1754944e-38, %v683_v52  ;;  %vm678_vm3 = vweird.f32 %v1559_v53  ;;  %vm1949_vm10 = vmor %vm1022_vm15, %vm1023_vm2 }
  0xb2   : > { %v794_v24 = vsub.f32 1.0, %v793_v4  ;;  %v1145_v16 = vmul.f32 %v790_v2, %v1750_v25  ;;  %vm1916_vm4 = vcmp.eq.f32.partialorder %v1026_v45, 8.507059e+37  ;;  %vm1920_vm5 = vcmp.eq.f32.partialorder %v801_v58, 8.507059e+37  ;;  %vm679_vm8 = vmor %vm677_vm13, %vm678_vm3 }
  0xb3   : > { %v905_v10 = vsel %vm1906_vm1, %v1822_v20, %v901_v60  ;;  %v675_v11 = vmul.f32 %v1559_v53, %v674_v3  ;;  %v804_v21 = vor.u32 1.1754944e-38, %v803_v0  ;;  %1566 = vpow2.f32 %v1380_v1  ;;  %v424_v60 = vpop.f32.mrf.mxu2 }
  0xb4   : > { %v795_v23 = vmul.f32 %v1561_v63, %v794_v24  ;;  %vm798_vm6 = vweird.f32 %v1561_v63  ;;  %vm917_vm7 = vweird.f32 %v1882_v56  ;;  %v1925_v20 = vadd.f32 1.0, %v1563_v12 }
  0xb5   : > { %v676_v22 = vadd.f32 %v1559_v53, %v675_v11  ;;  %v1565_v27 = vpop.eup %1564  ;;  %v910_v25 = vsel %vm1873_vm12, %v909_v43, %v905_v10  ;;  %v1021_v28 = vadd.f32 %v1841_v31, %v1020_v8  ;;  %v1388_v32 = vmul.f32 -1.442695, %v1839_v30  ;;  %vm799_vm9 = vmor %vm797_vm0, %vm798_vm6  ;;  %v444_v11 = vpop.f32.mrf.mxu3 }
  0xb6   : > { %v479_v33 = vmul.f32 %v1737_v18, %v422_v5  ;;  %v796_v40 = vadd.f32 %v1561_v63, %v795_v23  ;;  %v913_v41 = vmul.f32 %v1565_v27, %v1882_v56  ;;  %v921_v42 = vand.u32 2147483647, %v1882_v56 }
  0xb7   : > { %v680_v35 = vsel %vm679_vm8, %v1559_v53, %v676_v22  ;;  %v923_v13 = vand.u32 2147483648, %v1882_v56  ;;  %1568 = vrcp.f32 %v1925_v20  ;;  %v487_v45 = vmul.f32 %v1737_v18, %v442_v26 }
  0xb8   : > { %v685_v43 = vsel %vm1888_vm14, %v684_v9, %v680_v35  ;;  %v800_v49 = vsel %vm799_vm9, %v1561_v63, %v796_v40  ;;  %v914_v50 = vsub.f32 1.0, %v913_v41  ;;  %v464_v14 = vmul.f32 %v1737_v18, %v384_v34 }
  0xb9   : > { %v1138_v48 = vmul.f32 %v685_v43, %v1765_v38  ;;  %v1567_v52 = vpop.eup %1566  ;;  %v1025_v53 = vsel %vm1949_vm10, %v1841_v31, %v1021_v28  ;;  %v805_v57 = vsel %vm1920_vm5, %v804_v21, %v800_v49  ;;  %1570 = vpow2.f32 %v1388_v32  ;;  %v404_v31 = vpop.f32.mrf.mxu1 }
  0xba   : > { %v1968_v38 = vadd.f32 %v1742_v19, %v479_v33  ;;  %v1146_v55 = vmul.f32 %v805_v57, %v1768_v39  ;;  %v915_v59 = vmul.f32 %v1565_v27, %v914_v50  ;;  %vm918_vm11 = vweird.f32 %v1565_v27 }
  0xbb   : > { %v1431_v46 = vpack.c.bf16 %v1138_v48, %v1137_v6  ;;  %v1153_v61 = vmul.f32 %v910_v25, %v1759_v36  ;;  %v1972_v62 = vadd.f32 1.0, %v1567_v52  ;;  %v1976_v58 = vadd.f32 %v1742_v19, %v487_v45  ;;  %vm919_vm12 = vmor %vm917_vm7, %vm918_vm11 }
  0xbc   : > { %v1396_v63 = vmul.f32 -1.442695, %v1968_v38  ;;  %v1030_v0 = vsel %vm1916_vm4, %v1863_v44, %v1025_v53  ;;  %v1451_v39 = vpack.c.bf16 %v1146_v55, %v1145_v16  ;;  %v916_v1 = vadd.f32 %v1565_v27, %v915_v59 }
  0xbd   : > { %1432 = vst [vmem:[%s1963_s30] sm:$0xff] %v1431_v46   ;;  %v1983_v2 = vadd.f32 %v1742_v19, %v464_v14  ;;  %v1569_v3 = vpop.eup %1568  ;;  %v924_v36 = vor.u32 1.1754944e-38, %v923_v13  ;;  %1572 = vrcp.f32 %v1972_v62  ;;  %v472_v4 = vmul.f32 %v1737_v18, %v404_v31 }
  0xbe   : > { %v480_v5 = vmul.f32 %v1737_v18, %v424_v60  ;;  %1511 = vst [vmem:[%s1963_s30 + $0x20] sm:$0xff] %v1451_v39   ;;  %v920_v6 = vsel %vm919_vm12, %v1565_v27, %v916_v1  ;;  %vm922_vm13 = vcmp.eq.f32.partialorder %v921_v42, 8.507059e+37  ;;  %v1033_v44 = vmul.f32 %v1569_v3, %v1925_v20 }
  0xbf   : > { %1574 = vpow2.f32 %v1396_v63  ;;  %v1571_v7 = vpop.eup %1570  ;;  %v925_v8 = vsel %vm922_vm13, %v924_v36, %v920_v6  ;;  %v1041_v9 = vand.u32 2147483647, %v1925_v20  ;;  %v1043_v56 = vand.u32 2147483648, %v1925_v20 }
  0xc0   : > { %v1404_v10 = vmul.f32 -1.442695, %v1976_v58  ;;  %v1154_v24 = vmul.f32 %v925_v8, %v1782_v51  ;;  %v1034_v12 = vsub.f32 1.0, %v1033_v44  ;;  %v1996_v16 = vadd.f32 1.0, %v1571_v7 }
  0xc1   : > { %v1381_v54 = vmul.f32 -1.442695, %v1983_v2  ;;  %vm1038_vm14 = vweird.f32 %v1569_v3  ;;  %v2000_v17 = vadd.f32 %v1742_v19, %v472_v4  ;;  %v2003_v21 = vadd.f32 %v1742_v19, %v480_v5 }
  0xc2   : > { %1576 = vpow2.f32 %v1404_v10  ;;  %v1471_v22 = vpack.c.bf16 %v1154_v24, %v1153_v61  ;;  %v1035_v23 = vmul.f32 %v1569_v3, %v1034_v12  ;;  %v488_v51 = vmul.f32 %v1737_v18, %v444_v11 }
  0xc3   : > { %1578 = vrcp.f32 %v1996_v16  ;;  %v2007_v26 = vpop.eup %1572  ;;  %v1389_v27 = vmul.f32 -1.442695, %v2000_v17  ;;  %v1161_v28 = vmul.f32 %v1030_v0, %v1762_v37  ;;  %vm1037_vm15 = vweird.f32 %v1925_v20 }
  0xc4   : > { %1580 = vpow2.f32 %v1381_v54  ;;  %1515 = vst [vmem:[%s1963_s30 + $0x40] sm:$0xff] %v1471_v22   ;;  %v1036_v32 = vadd.f32 %v1569_v3, %v1035_v23  ;;  %v688_v33 = vmul.f32 %v2007_v26, %v1972_v62  ;;  %vm1039_vm0 = vmor %vm1037_vm15, %vm1038_vm14  ;;  %v1044_v34 = vor.u32 1.1754944e-38, %v1043_v56 }
  0xc5   : > { %v1575_v25 = vpop.eup %1574  ;;  %1582 = vpow2.f32 %v1389_v27  ;;  %v1397_v40 = vmul.f32 -1.442695, %v2003_v21  ;;  %vm1042_vm1 = vcmp.eq.f32.partialorder %v1041_v9, 8.507059e+37  ;;  %v2020_v37 = vadd.f32 %v1742_v19, %v488_v51 }
  0xc6   : > { %v2016_v35 = vadd.f32 1.0, %v1575_v25  ;;  %v1040_v41 = vsel %vm1039_vm0, %v1569_v3, %v1036_v32  ;;  %v689_v42 = vsub.f32 1.0, %v688_v33  ;;  %vm692_vm2 = vweird.f32 %v1972_v62 }
  0xc7   : > { %v1045_v13 = vsel %vm1042_vm1, %v1044_v34, %v1040_v41  ;;  %v696_v20 = vand.u32 2147483647, %v1972_v62  ;;  %v698_v49 = vand.u32 2147483648, %v1972_v62  ;;  %v816_v53 = vand.u32 2147483647, %v1996_v16 }
  0xc8   : > { %v1577_v43 = vpop.eup %1576  ;;  %1584 = vrcp.f32 %v2016_v35  ;;  %v1162_v47 = vmul.f32 %v1045_v13, %v1818_v15  ;;  %v690_v48 = vmul.f32 %v2007_v26, %v689_v42  ;;  %v1405_v57 = vmul.f32 -1.442695, %v2020_v37 }
  0xc9   : > { %v2025_v45 = vpop.eup %1578  ;;  %v2030_v50 = vadd.f32 1.0, %v1577_v43  ;;  %1586 = vpow2.f32 %v1397_v40  ;;  %vm693_vm3 = vweird.f32 %v2007_v26  ;;  %vm2039_vm4 = vcmp.eq.f32.partialorder %v696_v20, 8.507059e+37 }
  0xca   : > { %v1581_v14 = vpop.eup %1580  ;;  %v808_v52 = vmul.f32 %v2025_v45, %v1996_v16  ;;  %v1491_v46 = vpack.c.bf16 %v1162_v47, %v1161_v28  ;;  %v691_v55 = vadd.f32 %v2007_v26, %v690_v48  ;;  %v818_v60 = vand.u32 2147483648, %v1996_v16  ;;  %vm2053_vm5 = vmor %vm692_vm2, %vm693_vm3  ;;  %v387_v47 = vpop.f32.mrf.mxu0 }
  0xcb   : > { %1588 = vrcp.f32 %v2030_v50  ;;  %v1583_v15 = vpop.eup %1582  ;;  %v936_v61 = vand.u32 2147483647, %v2016_v35  ;;  %v938_v63 = vand.u32 2147483648, %v2016_v35  ;;  %v2047_v0 = vadd.f32 1.0, %v1581_v14  ;;  %v407_v48 = vpop.f32.mrf.mxu1 }
  0xcc   : > { %v809_v31 = vsub.f32 1.0, %v808_v52  ;;  %1519 = vst [vmem:[%s1963_s30 + $0x60] sm:$0xff] %v1491_v46   ;;  %v2049_v39 = vadd.f32 1.0, %v1583_v15  ;;  %1590 = vpow2.f32 %v1405_v57  ;;  %v699_v36 = vor.u32 1.1754944e-38, %v698_v49 }
  0xcd   : > { %vm812_vm6 = vweird.f32 %v1996_v16  ;;  %vm2059_vm7 = vcmp.eq.f32.partialorder %v816_v53, 8.507059e+37  ;;  %v695_v6 = vsel %vm2053_vm5, %v2007_v26, %v691_v55  ;;  %vm813_vm8 = vweird.f32 %v2025_v45  ;;  %v427_v53 = vpop.f32.mrf.mxu2 }
  0xce   : > { %v1585_v1 = vpop.eup %1584  ;;  %v810_v4 = vmul.f32 %v2025_v45, %v809_v31  ;;  %1592 = vrcp.f32 %v2047_v0  ;;  %v819_v8 = vor.u32 1.1754944e-38, %v818_v60  ;;  %vm932_vm9 = vweird.f32 %v2016_v35  ;;  %vm2083_vm11 = vmor %vm812_vm6, %vm813_vm8 }
  0xcf   : > { %v928_v62 = vmul.f32 %v1585_v1, %v2016_v35  ;;  %v1587_v44 = vpop.eup %1586  ;;  %v1058_v9 = vand.u32 2147483648, %v2030_v50  ;;  %vm2074_vm10 = vcmp.eq.f32.partialorder %v936_v61, 8.507059e+37  ;;  %v939_v24 = vor.u32 1.1754944e-38, %v938_v63 }
  0xd0   : > { %v811_v7 = vadd.f32 %v2025_v45, %v810_v4  ;;  %1594 = vrcp.f32 %v2049_v39  ;;  %v700_v12 = vsel %vm2039_vm4, %v699_v36, %v695_v6  ;;  %vm1052_vm12 = vweird.f32 %v2030_v50 }
  0xd1   : > { %v2072_v56 = vpop.eup %1588  ;;  %v929_v10 = vsub.f32 1.0, %v928_v62  ;;  %v1056_v23 = vand.u32 2147483647, %v2030_v50  ;;  %v711_v51 = vand.u32 2147483647, %v2047_v0  ;;  %vm933_vm13 = vweird.f32 %v1585_v1 }
  0xd2   : > { %v1048_v22 = vmul.f32 %v2072_v56, %v2030_v50  ;;  %v1591_v26 = vpop.eup %1590  ;;  %v815_v27 = vsel %vm2083_vm11, %v2025_v45, %v811_v7  ;;  %v713_v16 = vand.u32 2147483648, %v2047_v0  ;;  %v2096_v32 = vor.u32 1.1754944e-38, %v1058_v9  ;;  %vm934_vm0 = vmor %vm932_vm9, %vm933_vm13 }
  0xd3   : > { %v930_v25 = vmul.f32 %v1585_v1, %v929_v10  ;;  %v831_v33 = vand.u32 2147483647, %v2049_v39  ;;  %v2099_v34 = vadd.f32 1.0, %v1587_v44  ;;  %v2102_v41 = vmul.f32 %v700_v12, %v1836_v29 }
  0xd4   : > { %v1049_v28 = vsub.f32 1.0, %v1048_v22  ;;  %v1593_v40 = vpop.eup %1592  ;;  %vm1053_vm14 = vweird.f32 %v2072_v56  ;;  %vm707_vm15 = vweird.f32 %v2047_v0  ;;  %v820_v43 = vsel %vm2059_vm7, %v819_v8, %v815_v27  ;;  %v447_v22 = vpop.f32.mrf.mxu3 }
  0xd5   : > { %v931_v42 = vadd.f32 %v1585_v1, %v930_v25  ;;  %v703_v20 = vmul.f32 %v1593_v40, %v2047_v0  ;;  %vm2112_vm1 = vcmp.eq.f32.partialorder %v711_v51, 8.507059e+37  ;;  %vm827_vm2 = vweird.f32 %v2049_v39  ;;  %vm2144_vm5 = vmor %vm1052_vm12, %vm1053_vm14 }
  0xd6   : > { %v1050_v13 = vmul.f32 %v2072_v56, %v1049_v28  ;;  %v2117_v29 = vadd.f32 1.0, %v1591_v26  ;;  %v1595_v49 = vpop.eup %1594  ;;  %v714_v52 = vor.u32 1.1754944e-38, %v713_v16  ;;  %v833_v35 = vand.u32 2147483648, %v2049_v39 }
  0xd7   : > { %v935_v14 = vsel %vm934_vm0, %v1585_v1, %v931_v42  ;;  %1596 = vrcp.f32 %v2099_v34  ;;  %v704_v55 = vsub.f32 1.0, %v703_v20  ;;  %v823_v15 = vmul.f32 %v1595_v49, %v2049_v39 }
  0xd8   : > { %v940_v57 = vsel %vm2074_vm10, %v939_v24, %v935_v14  ;;  %v2124_v46 = vadd.f32 %v2072_v56, %v1050_v13  ;;  %vm2127_vm3 = vcmp.eq.f32.partialorder %v831_v33, 8.507059e+37  ;;  %vm708_vm4 = vweird.f32 %v1593_v40  ;;  %v429_v13 = vpop.f32.mrf.mxu2 }
  0xd9   : > { %v953_v31 = vand.u32 2147483648, %v2099_v34  ;;  %v465_v60 = vmul.f32 %v1737_v18, %v387_v47  ;;  %v473_v61 = vmul.f32 %v1737_v18, %v407_v48  ;;  %v705_v63 = vmul.f32 %v1593_v40, %v704_v55  ;;  %vm709_vm9 = vmor %vm707_vm15, %vm708_vm4 }
  0xda   : > { %v824_v1 = vsub.f32 1.0, %v823_v15  ;;  %v951_v3 = vand.u32 2147483647, %v2099_v34  ;;  %1598 = vrcp.f32 %v2117_v29  ;;  %v1147_v36 = vmul.f32 %v820_v43, %v1839_v30  ;;  %v409_v43 = vpop.f32.mrf.mxu1 }
  0xdb   : > { %v2138_v4 = vmul.f32 %v940_v57, %v1968_v38  ;;  %vm828_vm6 = vweird.f32 %v1595_v49  ;;  %v834_v6 = vor.u32 1.1754944e-38, %v833_v35  ;;  %v1055_v62 = vsel %vm2144_vm5, %v2072_v56, %v2124_v46 }
  0xdc   : > { %v706_v44 = vadd.f32 %v1593_v40, %v705_v63  ;;  %v825_v30 = vmul.f32 %v1595_v49, %v824_v1  ;;  %vm947_vm7 = vweird.f32 %v2099_v34  ;;  %v954_v38 = vor.u32 1.1754944e-38, %v953_v31  ;;  %vm829_vm11 = vmor %vm827_vm2, %vm828_vm6  ;;  %v449_v5 = vpop.f32.mrf.mxu3 }
  0xdd   : > { %v1597_v7 = vpop.eup %1596  ;;  %vm2153_vm8 = vcmp.eq.f32.partialorder %v1056_v23, 8.507059e+37  ;;  %v1071_v50 = vand.u32 2147483647, %v2117_v29  ;;  %v2162_v9 = vadd.f32 %v1742_v19, %v465_v60  ;;  %v2165_v56 = vadd.f32 %v1742_v19, %v473_v61 }
  0xde   : > { %v481_v10 = vmul.f32 %v1737_v18, %v427_v53  ;;  %v710_v11 = vsel %vm709_vm9, %v1593_v40, %v706_v44  ;;  %v826_v24 = vadd.f32 %v1595_v49, %v825_v30  ;;  %v943_v12 = vmul.f32 %v1597_v7, %v2099_v34  ;;  %v389_v40 = vpop.f32.mrf.mxu0 }
  0xdf   : > { %vm2169_vm10 = vcmp.eq.f32.partialorder %v951_v3, 8.507059e+37  ;;  %v1073_v0 = vand.u32 2147483648, %v2117_v29  ;;  %v715_v23 = vsel %vm2112_vm1, %v714_v52, %v710_v11  ;;  %vm948_vm12 = vweird.f32 %v1597_v7 }
  0xe0   : > { %v1382_v51 = vmul.f32 -1.442695, %v2162_v9  ;;  %v1390_v26 = vmul.f32 -1.442695, %v2165_v56  ;;  %v1599_v27 = vpop.eup %1598  ;;  %v1140_v25 = vmul.f32 %v715_v23, %v1983_v2  ;;  %v830_v16 = vsel %vm829_vm11, %v1595_v49, %v826_v24  ;;  %vm949_vm14 = vmor %vm947_vm7, %vm948_vm12 }
  0xe1   : > { %v944_v28 = vsub.f32 1.0, %v943_v12  ;;  %v2183_v33 = vadd.f32 %v1742_v19, %v481_v10  ;;  %v835_v42 = vsel %vm2127_vm3, %v834_v6, %v830_v16  ;;  %v1063_v39 = vmul.f32 %v1599_v27, %v2117_v29 }
  0xe2   : > { %vm1068_vm13 = vweird.f32 %v1599_v27  ;;  %1600 = vpow2.f32 %v1382_v51  ;;  %v1436_v20 = vpack.c.bf16 %v1140_v25, %v2102_v41  ;;  %v1148_v2 = vmul.f32 %v835_v42, %v2000_v17 }
  0xe3   : > { %v945_v45 = vmul.f32 %v1597_v7, %v944_v28  ;;  %1602 = vpow2.f32 %v1390_v26  ;;  %v1064_v47 = vsub.f32 1.0, %v1063_v39  ;;  %v1398_v48 = vmul.f32 -1.442695, %v2183_v33 }
  0xe4   : > { %v489_v49 = vmul.f32 %v1737_v18, %v447_v22  ;;  %v466_v14 = vmul.f32 %v1737_v18, %v389_v40  ;;  %1508 = vst [vmem:[%s1963_s30 + $0x8] sm:$0xff] %v1436_v20   ;;  %v1456_v52 = vpack.c.bf16 %v1148_v2, %v1147_v36  ;;  %v474_v53 = vmul.f32 %v1737_v18, %v409_v43 }
  0xe5   : > { %v946_v35 = vadd.f32 %v1597_v7, %v945_v45  ;;  %v482_v57 = vmul.f32 %v1737_v18, %v429_v13  ;;  %v1065_v17 = vmul.f32 %v1599_v27, %v1064_v47  ;;  %1604 = vpow2.f32 %v1398_v48  ;;  %v412_v13 = vpop.f32.mrf.mxu1 }
  0xe6   : > { %v2200_v41 = vadd.f32 %v1742_v19, %v489_v49  ;;  %v2203_v46 = vadd.f32 %v1742_v19, %v466_v14  ;;  %v1060_v55 = vsel %vm2153_vm8, %v2096_v32, %v1055_v62  ;;  %1512 = vst [vmem:[%s1963_s30 + $0x28] sm:$0xff] %v1456_v52   ;;  %vm1067_vm15 = vweird.f32 %v2117_v29  ;;  %v392_v16 = vpop.f32.mrf.mxu0 }
  0xe7   : > { %v950_v15 = vsel %vm949_vm14, %v1597_v7, %v946_v35  ;;  %vm2210_vm0 = vcmp.eq.f32.partialorder %v1071_v50, 8.507059e+37  ;;  %v1066_v60 = vadd.f32 %v1599_v27, %v1065_v17  ;;  %v2218_v63 = vadd.f32 %v1742_v19, %v474_v53  ;;  %vm1069_vm1 = vmor %vm1067_vm15, %vm1068_vm13 }
  0xe8   : > { %v1601_v34 = vpop.eup %1600  ;;  %v955_v31 = vsel %vm2169_vm10, %v954_v38, %v950_v15  ;;  %v1406_v61 = vmul.f32 -1.442695, %v2200_v41  ;;  %v1074_v29 = vor.u32 1.1754944e-38, %v1073_v0  ;;  %v2225_v36 = vadd.f32 %v1742_v19, %v482_v57 }
  0xe9   : > { %v1603_v1 = vpop.eup %1602  ;;  %v1156_v32 = vmul.f32 %v955_v31, %v2003_v21  ;;  %v2222_v3 = vadd.f32 1.0, %v1601_v34  ;;  %v1070_v6 = vsel %vm1069_vm1, %v1599_v27, %v1066_v60  ;;  %v1383_v44 = vmul.f32 -1.442695, %v2203_v46  ;;  %v2410_v31 = vld [vmem:[%s2656_s2] ss:$0 sm:$0xff] }
  0xea   : > { %v2227_v62 = vadd.f32 1.0, %v1603_v1  ;;  %1606 = vpow2.f32 %v1406_v61  ;;  %v1163_v30 = vmul.f32 %v1060_v55, %v1976_v58  ;;  %v1075_v38 = vsel %vm2210_vm0, %v1074_v29, %v1070_v6 }
  0xeb   : > { %v1476_v21 = vpack.c.bf16 %v1156_v32, %v2138_v4  ;;  %1608 = vrcp.f32 %v2222_v3  ;;  %v1605_v7 = vpop.eup %1604  ;;  %v1164_v8 = vmul.f32 %v1075_v38, %v2020_v37  ;;  %v1391_v50 = vmul.f32 -1.442695, %v2218_v63 }
  0xec   : > { %1610 = vrcp.f32 %v2227_v62  ;;  %v490_v10 = vmul.f32 %v1737_v18, %v449_v5  ;;  %v2240_v11 = vadd.f32 1.0, %v1605_v7  ;;  %v1399_v4 = vmul.f32 -1.442695, %v2225_v36 }
  0xed   : > { %1516 = vst [vmem:[%s1963_s30 + $0x48] sm:$0xff] %v1476_v21   ;;  %v1496_v58 = vpack.c.bf16 %v1164_v8, %v1163_v30  ;;  %1612 = vpow2.f32 %v1383_v44  ;;  %v728_v12 = vand.u32 2147483648, %v2222_v3  ;;  %v848_v0 = vand.u32 2147483648, %v2227_v62 }
  0xee   : > { %1614 = vrcp.f32 %v2240_v11  ;;  %v2247_v37 = vadd.f32 %v1742_v19, %v490_v10  ;;  %vm722_vm2 = vweird.f32 %v2222_v3  ;;  %v726_v26 = vand.u32 2147483647, %v2222_v3 }
  0xef   : > { %1520 = vst [vmem:[%s1963_s30 + $0x68] sm:$0xff] %v1496_v58   ;;  %1616 = vpow2.f32 %v1391_v50  ;;  %vm842_vm3 = vweird.f32 %v2227_v62  ;;  %v846_v25 = vand.u32 2147483647, %v2227_v62  ;;  %v729_v42 = vor.u32 1.1754944e-38, %v728_v12 }
  0xf0   : > { %v1607_v24 = vpop.eup %1606  ;;  %1618 = vpow2.f32 %v1399_v4  ;;  %v966_v39 = vand.u32 2147483647, %v2240_v11  ;;  %v1407_v43 = vmul.f32 -1.442695, %v2247_v37  ;;  %v849_v45 = vor.u32 1.1754944e-38, %v848_v0 }
  0xf1   : > { %v2249_v54 = vpop.eup %1608  ;;  %v2252_v22 = vadd.f32 1.0, %v1607_v24  ;;  %vm962_vm4 = vweird.f32 %v2240_v11  ;;  %vm2271_vm5 = vcmp.eq.f32.partialorder %v726_v26, 8.507059e+37  ;;  %v968_v35 = vand.u32 2147483648, %v2240_v11 }
  0xf2   : > { %v2254_v23 = vpop.eup %1610  ;;  %v718_v51 = vmul.f32 %v2249_v54, %v2222_v3  ;;  %v467_v53 = vmul.f32 %v1737_v18, %v392_v16  ;;  %vm723_vm6 = vweird.f32 %v2249_v54  ;;  %vm2280_vm7 = vcmp.eq.f32.partialorder %v846_v25, 8.507059e+37  ;;  %v2423_v3 = vld [vmem:[%s2657_s3] ss:$0 sm:$0xff] }
  0xf3   : > { %v838_v27 = vmul.f32 %v2254_v23, %v2227_v62  ;;  %1620 = vrcp.f32 %v2252_v22  ;;  %v1613_v28 = vpop.eup %1612  ;;  %v475_v55 = vmul.f32 %v1737_v18, %v412_v13  ;;  %vm2287_vm8 = vcmp.eq.f32.partialorder %v966_v39, 8.507059e+37  ;;  %vm2307_vm11 = vmor %vm722_vm2, %vm723_vm6 }
  0xf4   : > { %v719_v40 = vsub.f32 1.0, %v718_v51  ;;  %v1615_v20 = vpop.eup %1614  ;;  %v2268_v47 = vadd.f32 1.0, %v1613_v28  ;;  %vm843_vm9 = vweird.f32 %v2254_v23  ;;  %v1088_v1 = vand.u32 2147483648, %v2252_v22 }
  0xf5   : > { %v839_v2 = vsub.f32 1.0, %v838_v27  ;;  %v1617_v48 = vpop.eup %1616  ;;  %v958_v52 = vmul.f32 %v1615_v20, %v2240_v11  ;;  %vm963_vm10 = vweird.f32 %v1615_v20  ;;  %v2301_v5 = vadd.f32 %v1742_v19, %v467_v53  ;;  %vm2322_vm12 = vmor %vm842_vm3, %vm843_vm9 }
  0xf6   : > { %v720_v49 = vmul.f32 %v2249_v54, %v719_v40  ;;  %1622 = vrcp.f32 %v2268_v47  ;;  %v1619_v15 = vpop.eup %1618  ;;  %v2296_v32 = vadd.f32 1.0, %v1617_v48  ;;  %v969_v44 = vor.u32 1.1754944e-38, %v968_v35  ;;  %vm2333_vm13 = vmor %vm962_vm4, %vm963_vm10  ;;  %v432_v35 = vpop.f32.mrf.mxu2 }
  0xf7   : > { %v840_v57 = vmul.f32 %v2254_v23, %v839_v2  ;;  %v959_v34 = vsub.f32 1.0, %v958_v52  ;;  %1624 = vpow2.f32 %v1407_v43  ;;  %v1086_v30 = vand.u32 2147483647, %v2252_v22 }
  0xf8   : > { %v721_v59 = vadd.f32 %v2249_v54, %v720_v49  ;;  %v2312_v21 = vadd.f32 1.0, %v1619_v15  ;;  %v2315_v38 = vadd.f32 %v1742_v19, %v475_v55  ;;  %v741_v10 = vand.u32 2147483647, %v2268_v47 }
  0xf9   : > { %v2291_v60 = vpop.eup %1620  ;;  %v841_v61 = vadd.f32 %v2254_v23, %v840_v57  ;;  %v960_v18 = vmul.f32 %v1615_v20, %v959_v34  ;;  %vm1082_vm14 = vweird.f32 %v2252_v22  ;;  %v2338_v62 = vor.u32 1.1754944e-38, %v1088_v1 }
  0xfa   : > { %v1078_v29 = vmul.f32 %v2291_v60, %v2252_v22  ;;  %v725_v7 = vsel %vm2307_vm11, %v2249_v54, %v721_v59  ;;  %v743_v24 = vand.u32 2147483648, %v2268_v47  ;;  %1626 = vrcp.f32 %v2296_v32 }
  0xfb   : > { %v961_v8 = vadd.f32 %v1615_v20, %v960_v18  ;;  %v845_v19 = vsel %vm2322_vm12, %v2254_v23, %v841_v61  ;;  %vm737_vm15 = vweird.f32 %v2268_v47  ;;  %v1384_v11 = vmul.f32 -1.442695, %v2301_v5 }
  0xfc   : > { %v1079_v50 = vsub.f32 1.0, %v1078_v29  ;;  %v1623_v58 = vpop.eup %1622  ;;  %v730_v23 = vsel %vm2271_vm5, %v729_v42, %v725_v7  ;;  %vm1083_vm0 = vweird.f32 %v2291_v60  ;;  %1628 = vrcp.f32 %v2312_v21 }
  0xfd   : > { %v1625_v12 = vpop.eup %1624  ;;  %v965_v54 = vsel %vm2333_vm13, %v1615_v20, %v961_v8  ;;  %v733_v0 = vmul.f32 %v1623_v58, %v2268_v47  ;;  %v850_v26 = vsel %vm2280_vm7, %v849_v45, %v845_v19  ;;  %vm2354_vm1 = vcmp.eq.f32.partialorder %v741_v10, 8.507059e+37  ;;  %vm2391_vm7 = vmor %vm1082_vm14, %vm1083_vm0  ;;  %v394_v19 = vpop.f32.mrf.mxu0 }
  0xfe   : > { %v1080_v51 = vmul.f32 %v2291_v60, %v1079_v50  ;;  %v861_v16 = vand.u32 2147483647, %v2296_v32  ;;  %v970_v28 = vsel %vm2287_vm8, %v969_v44, %v965_v54  ;;  %vm738_vm2 = vweird.f32 %v1623_v58  ;;  %v452_v44 = vpop.f32.mrf.mxu3 }
  0xff   : > { %v734_v27 = vsub.f32 1.0, %v733_v0  ;;  %v744_v40 = vor.u32 1.1754944e-38, %v743_v24  ;;  %v2361_v42 = vadd.f32 1.0, %v1625_v12  ;;  %v863_v43 = vand.u32 2147483648, %v2296_v32  ;;  %vm739_vm5 = vmor %vm737_vm15, %vm738_vm2 }
 0x100   : > { %1630 = vpow2.f32 %v1384_v11  ;;  %v1392_v13 = vmul.f32 -1.442695, %v2315_v38  ;;  %v1627_v20 = vpop.eup %1626  ;;  %v1141_v2 = vmul.f32 %v730_v23, %v2162_v9  ;;  %v2367_v45 = vmul.f32 %v850_v26, %v2165_v56 }
 0x101   : > { %v735_v39 = vmul.f32 %v1623_v58, %v734_v27  ;;  %v2370_v48 = vadd.f32 %v2291_v60, %v1080_v51  ;;  %1632 = vrcp.f32 %v2361_v42  ;;  %v853_v14 = vmul.f32 %v1627_v20, %v2296_v32 }
 0x102   : > { %vm857_vm3 = vweird.f32 %v2296_v32  ;;  %vm2375_vm4 = vcmp.eq.f32.partialorder %v861_v16, 8.507059e+37  ;;  %v1629_v53 = vpop.eup %1628  ;;  %v2380_v9 = vmul.f32 %v970_v28, %v2183_v33  ;;  %vm977_vm6 = vweird.f32 %v2312_v21  ;;  %v414_v16 = vpop.f32.mrf.mxu1 }
 0x103   : > { %v736_v49 = vadd.f32 %v1623_v58, %v735_v39  ;;  %v981_v56 = vand.u32 2147483647, %v2312_v21  ;;  %1634 = vpow2.f32 %v1392_v13  ;;  %vm2395_vm8 = vcmp.eq.f32.partialorder %v1086_v30, 8.507059e+37 }
 0x104   : > { %v854_v47 = vsub.f32 1.0, %v853_v14  ;;  %v864_v55 = vor.u32 1.1754944e-38, %v863_v43  ;;  %v973_v15 = vmul.f32 %v1629_v53, %v2312_v21  ;;  %v1085_v59 = vsel %vm2391_vm7, %v2291_v60, %v2370_v48  ;;  %v434_v14 = vpop.f32.mrf.mxu2 }
 0x105   : > { %v740_v17 = vsel %vm739_vm5, %v1623_v58, %v736_v49  ;;  %v983_v34 = vand.u32 2147483648, %v2312_v21  ;;  %v483_v61 = vmul.f32 %v2410_v31, %v432_v35  ;;  %vm858_vm9 = vweird.f32 %v1627_v20 }
 0x106   : > { %v745_v22 = vsel %vm2354_vm1, %v744_v40, %v740_v17  ;;  %v1631_v1 = vpop.eup %1630  ;;  %v855_v29 = vmul.f32 %v1627_v20, %v854_v47  ;;  %v974_v6 = vsub.f32 1.0, %v973_v15  ;;  %vm978_vm10 = vweird.f32 %v1629_v53  ;;  %vm859_vm12 = vmor %vm857_vm3, %vm858_vm9  ;;  %v454_v35 = vpop.f32.mrf.mxu3 }
 0x107   : > { %v1142_v18 = vmul.f32 %v745_v22, %v2203_v46  ;;  %v1633_v60 = vpop.eup %1632  ;;  %vm2414_vm11 = vcmp.eq.f32.partialorder %v981_v56, 8.507059e+37  ;;  %v2418_v7 = vadd.f32 1.0, %v1631_v1  ;;  %v2426_v46 = vadd.f32 %v2423_v3, %v483_v61  ;;  %vm979_vm13 = vmor %vm977_vm6, %vm978_vm10 }
 0x108   : > { %v856_v50 = vadd.f32 %v1627_v20, %v855_v29  ;;  %v975_v10 = vmul.f32 %v1629_v53, %v974_v6  ;;  %v1093_v58 = vmul.f32 %v1633_v60, %v2361_v42  ;;  %v984_v24 = vor.u32 1.1754944e-38, %v983_v34 }
 0x109   : > { %v1441_v8 = vpack.c.bf16 %v1142_v18, %v1141_v2  ;;  %v1635_v4 = vpop.eup %1634  ;;  %v1101_v12 = vand.u32 2147483647, %v2361_v42  ;;  %v1103_v54 = vand.u32 2147483648, %v2361_v42  ;;  %1636 = vrcp.f32 %v2418_v7 }
 0x10a   : > { %v860_v0 = vsel %vm859_vm12, %v1627_v20, %v856_v50  ;;  %v976_v11 = vadd.f32 %v1629_v53, %v975_v10  ;;  %v1094_v23 = vsub.f32 1.0, %v1093_v58  ;;  %v491_v51 = vmul.f32 %v2410_v31, %v452_v44 }
 0x10b   : > { %1509 = vst [vmem:[%s1963_s30 + $0x10] sm:$0xff] %v1441_v8   ;;  %v865_v26 = vsel %vm2375_vm4, %v864_v55, %v860_v0  ;;  %v2442_v32 = vadd.f32 1.0, %v1635_v4  ;;  %v1400_v27 = vmul.f32 -1.442695, %v2426_v46  ;;  %v468_v25 = vmul.f32 %v2410_v31, %v394_v19 }
 0x10c   : > { %v1150_v28 = vmul.f32 %v865_v26, %v2218_v63  ;;  %v980_v40 = vsel %vm979_vm13, %v1629_v53, %v976_v11  ;;  %v1095_v39 = vmul.f32 %v1633_v60, %v1094_v23  ;;  %vm1098_vm14 = vweird.f32 %v1633_v60 }
 0x10d   : > { %v1090_v43 = vsel %vm2395_vm8, %v2338_v62, %v1085_v59  ;;  %v985_v21 = vsel %vm2414_vm11, %v984_v24, %v980_v40  ;;  %vm1097_vm15 = vweird.f32 %v2361_v42  ;;  %1638 = vrcp.f32 %v2442_v32 }
 0x10e   : > { %v1461_v13 = vpack.c.bf16 %v1150_v28, %v2367_v45  ;;  %v1158_v20 = vmul.f32 %v985_v21, %v2225_v36  ;;  %v1096_v63 = vadd.f32 %v1633_v60, %v1095_v39  ;;  %v476_v2 = vmul.f32 %v2410_v31, %v414_v16  ;;  %vm1099_vm0 = vmor %vm1097_vm15, %vm1098_vm14 }
 0x10f   : > { %v2457_v48 = vpop.eup %1636  ;;  %v1104_v49 = vor.u32 1.1754944e-38, %v1103_v54  ;;  %1640 = vpow2.f32 %v1400_v27  ;;  %v2460_v62 = vadd.f32 %v2423_v3, %v491_v51  ;;  %v2463_v42 = vadd.f32 %v2423_v3, %v468_v25 }
 0x110   : > { %1513 = vst [vmem:[%s1963_s30 + $0x30] sm:$0xff] %v1461_v13   ;;  %v1481_v45 = vpack.c.bf16 %v1158_v20, %v2380_v9  ;;  %v1100_v36 = vsel %vm1099_vm0, %v1633_v60, %v1096_v63  ;;  %vm1102_vm1 = vcmp.eq.f32.partialorder %v1101_v12, 8.507059e+37  ;;  %v748_v52 = vmul.f32 %v2457_v48, %v2418_v7 }
 0x111   : > { %v1165_v53 = vmul.f32 %v1090_v43, %v2200_v41  ;;  %v1105_v56 = vsel %vm1102_vm1, %v1104_v49, %v1100_v36  ;;  %v1408_v57 = vmul.f32 -1.442695, %v2460_v62  ;;  %v1385_v33 = vmul.f32 -1.442695, %v2463_v42 }
 0x112   : > { %1517 = vst [vmem:[%s1963_s30 + $0x50] sm:$0xff] %v1481_v45   ;;  %v1166_v17 = vmul.f32 %v1105_v56, %v2247_v37  ;;  %v749_v47 = vsub.f32 1.0, %v748_v52  ;;  %v2475_v9 = vadd.f32 %v2423_v3, %v476_v2  ;;  %v484_v55 = vmul.f32 %v2410_v31, %v434_v14 }
 0x113   : > { %v2478_v15 = vpop.eup %1638  ;;  %1642 = vpow2.f32 %v1408_v57  ;;  %v492_v41 = vmul.f32 %v2410_v31, %v454_v35  ;;  %vm752_vm2 = vweird.f32 %v2418_v7  ;;  %vm753_vm3 = vweird.f32 %v2457_v48 }
 0x114   : > { %v1501_v59 = vpack.c.bf16 %v1166_v17, %v1165_v53  ;;  %v750_v22 = vmul.f32 %v2457_v48, %v749_v47  ;;  %v868_v34 = vmul.f32 %v2478_v15, %v2442_v32  ;;  %1644 = vpow2.f32 %v1385_v33  ;;  %vm2507_vm4 = vmor %vm752_vm2, %vm753_vm3 }
 0x115   : > { %v1641_v61 = vpop.eup %1640  ;;  %v1393_v37 = vmul.f32 -1.442695, %v2475_v9  ;;  %v2486_v1 = vadd.f32 %v2423_v3, %v484_v55  ;;  %v2489_v18 = vadd.f32 %v2423_v3, %v492_v41  ;;  %v758_v8 = vand.u32 2147483648, %v2418_v7 }
 0x116   : > { %1521 = vst [vmem:[%s1963_s30 + $0x70] sm:$0xff] %v1501_v59   ;;  %v869_v29 = vsub.f32 1.0, %v868_v34  ;;  %v2492_v6 = vadd.f32 1.0, %v1641_v61  ;;  %v751_v60 = vadd.f32 %v2457_v48, %v750_v22  ;;  %v756_v50 = vand.u32 2147483647, %v2418_v7 }
 0x117   : > { %1646 = vpow2.f32 %v1393_v37  ;;  %v1401_v31 = vmul.f32 -1.442695, %v2486_v1  ;;  %v1409_v44 = vmul.f32 -1.442695, %v2489_v18  ;;  %vm872_vm5 = vweird.f32 %v2442_v32 }
 0x118   : > { %v870_v30 = vmul.f32 %v2478_v15, %v869_v29  ;;  %1648 = vrcp.f32 %v2492_v6  ;;  %v755_v4 = vsel %vm2507_vm4, %v2457_v48, %v751_v60  ;;  %vm873_vm6 = vweird.f32 %v2478_v15 }
 0x119   : > { %v1643_v3 = vpop.eup %1642  ;;  %1650 = vpow2.f32 %v1401_v31  ;;  %v759_v54 = vor.u32 1.1754944e-38, %v758_v8  ;;  %v876_v7 = vand.u32 2147483647, %v2442_v32  ;;  %v878_v0 = vand.u32 2147483648, %v2442_v32  ;;  %vm2529_vm8 = vmor %vm872_vm5, %vm873_vm6 }
 0x11a   : > { %v2503_v10 = vadd.f32 1.0, %v1643_v3  ;;  %1652 = vpow2.f32 %v1409_v44  ;;  %v1645_v58 = vpop.eup %1644  ;;  %v871_v24 = vadd.f32 %v2478_v15, %v870_v30  ;;  %vm757_vm7 = vcmp.eq.f32.partialorder %v756_v50, 8.507059e+37 }
 0x11b   : > { %v2520_v11 = vadd.f32 1.0, %v1645_v58  ;;  %v998_v51 = vand.u32 2147483648, %v2492_v6  ;;  %v760_v25 = vsel %vm757_vm7, %v759_v54, %v755_v4  ;;  %vm877_vm9 = vcmp.eq.f32.partialorder %v876_v7, 8.507059e+37 }
 0x11c   : > { %1654 = vrcp.f32 %v2503_v10  ;;  %v875_v39 = vsel %vm2529_vm8, %v2478_v15, %v871_v24  ;;  %v879_v43 = vor.u32 1.1754944e-38, %v878_v0  ;;  %v996_v32 = vand.u32 2147483647, %v2492_v6 }
 0x11d   : > { %v1647_v12 = vpop.eup %1646  ;;  %1656 = vrcp.f32 %v2520_v11  ;;  %v2544_v20 = vmul.f32 %v760_v25, %v2301_v5  ;;  %vm992_vm10 = vweird.f32 %v2492_v6  ;;  %v2547_v63 = vor.u32 1.1754944e-38, %v998_v51 }
 0x11e   : > { %v2522_v23 = vpop.eup %1648  ;;  %v2525_v26 = vadd.f32 1.0, %v1647_v12  ;;  %v880_v49 = vsel %vm877_vm9, %v879_v43, %v875_v39  ;;  %vm1112_vm11 = vweird.f32 %v2503_v10  ;;  %v1118_v45 = vand.u32 2147483648, %v2503_v10 }
 0x11f   : > { %v1651_v27 = vpop.eup %1650  ;;  %v988_v28 = vmul.f32 %v2522_v23, %v2492_v6  ;;  %v1116_v36 = vand.u32 2147483647, %v2503_v10  ;;  %v771_v5 = vand.u32 2147483647, %v2520_v11  ;;  %v773_v52 = vand.u32 2147483648, %v2520_v11 }
 0x120   : > { %v1653_v40 = vpop.eup %1652  ;;  %1658 = vrcp.f32 %v2525_v26  ;;  %v2549_v2 = vadd.f32 1.0, %v1651_v27  ;;  %v891_v57 = vand.u32 2147483647, %v2525_v26  ;;  %v2565_v17 = vmul.f32 %v880_v49, %v2315_v38 }
 0x121   : > { %v989_v21 = vsub.f32 1.0, %v988_v28  ;;  %v2551_v48 = vadd.f32 1.0, %v1653_v40  ;;  %vm993_vm12 = vweird.f32 %v2522_v23  ;;  %v893_v55 = vand.u32 2147483648, %v2525_v26 }
 0x122   : > { %v2541_v13 = vpop.eup %1654  ;;  %1660 = vrcp.f32 %v2549_v2  ;;  %v1119_v41 = vor.u32 1.1754944e-38, %v1118_v45  ;;  %vm767_vm13 = vweird.f32 %v2520_v11  ;;  %vm2573_vm14 = vcmp.eq.f32.partialorder %v771_v5, 8.507059e+37  ;;  %vm2597_vm5 = vmor %vm992_vm10, %vm993_vm12 }
 0x123   : > { %v1108_v14 = vmul.f32 %v2541_v13, %v2503_v10  ;;  %v1657_v35 = vpop.eup %1656  ;;  %v990_v53 = vmul.f32 %v2522_v23, %v989_v21  ;;  %1662 = vrcp.f32 %v2551_v48  ;;  %v774_v38 = vor.u32 1.1754944e-38, %v773_v52 }
 0x124   : > { %v763_v47 = vmul.f32 %v1657_v35, %v2520_v11  ;;  %vm887_vm15 = vweird.f32 %v2525_v26  ;;  %vm2579_vm0 = vcmp.eq.f32.partialorder %v996_v32, 8.507059e+37  ;;  %vm1113_vm1 = vweird.f32 %v2541_v13 }
 0x125   : > { %v1109_v56 = vsub.f32 1.0, %v1108_v14  ;;  %v991_v61 = vadd.f32 %v2522_v23, %v990_v53  ;;  %vm2584_vm2 = vcmp.eq.f32.partialorder %v891_v57, 8.507059e+37  ;;  %vm2589_vm3 = vcmp.eq.f32.partialorder %v1116_v36, 8.507059e+37  ;;  %vm2607_vm8 = vmor %vm1112_vm11, %vm1113_vm1 }
 0x126   : > { %v1659_v33 = vpop.eup %1658  ;;  %v764_v22 = vsub.f32 1.0, %v763_v47  ;;  %vm768_vm4 = vweird.f32 %v1657_v35  ;;  %v894_v8 = vor.u32 1.1754944e-38, %v893_v55  ;;  %vm1007_vm7 = vweird.f32 %v2549_v2 }
 0x127   : > { %v1110_v15 = vmul.f32 %v2541_v13, %v1109_v56  ;;  %v883_v59 = vmul.f32 %v1659_v33, %v2525_v26  ;;  %vm888_vm6 = vweird.f32 %v1659_v33  ;;  %v1011_v6 = vand.u32 2147483647, %v2549_v2  ;;  %vm769_vm9 = vmor %vm767_vm13, %vm768_vm4 }
 0x128   : > { %v1661_v44 = vpop.eup %1660  ;;  %v765_v3 = vmul.f32 %v1657_v35, %v764_v22  ;;  %v1013_v54 = vand.u32 2147483648, %v2549_v2  ;;  %v995_v0 = vsel %vm2597_vm5, %v2522_v23, %v991_v61  ;;  %v1131_v27 = vand.u32 2147483647, %v2551_v48  ;;  %vm889_vm10 = vmor %vm887_vm15, %vm888_vm6 }
 0x129   : > { %v884_v29 = vsub.f32 1.0, %v883_v59  ;;  %v1111_v60 = vadd.f32 %v2541_v13, %v1110_v15  ;;  %v1663_v50 = vpop.eup %1662  ;;  %v1003_v4 = vmul.f32 %v1661_v44, %v2549_v2  ;;  %v1133_v40 = vand.u32 2147483648, %v2551_v48 }
 0x12a   : > { %v766_v12 = vadd.f32 %v1657_v35, %v765_v3  ;;  %v1123_v7 = vmul.f32 %v1663_v50, %v2551_v48  ;;  %vm1008_vm11 = vweird.f32 %v1661_v44  ;;  %vm1128_vm12 = vweird.f32 %v1663_v50 }
 0x12b   : > { %v885_v19 = vmul.f32 %v1659_v33, %v884_v29  ;;  %v1004_v10 = vsub.f32 1.0, %v1003_v4  ;;  %v1115_v25 = vsel %vm2607_vm8, %v2541_v13, %v1111_v60  ;;  %vm1012_vm13 = vcmp.eq.f32.partialorder %v1011_v6, 8.507059e+37 }
 0x12c   : > { %v770_v16 = vsel %vm769_vm9, %v1657_v35, %v766_v12  ;;  %v1124_v28 = vsub.f32 1.0, %v1123_v7  ;;  %vm1127_vm15 = vweird.f32 %v2551_v48  ;;  %v1000_v49 = vsel %vm2579_vm0, %v2547_v63, %v995_v0 }
 0x12d   : > { %v886_v51 = vadd.f32 %v1659_v33, %v885_v19  ;;  %v775_v11 = vsel %vm2573_vm14, %v774_v38, %v770_v16  ;;  %v1005_v39 = vmul.f32 %v1661_v44, %v1004_v10  ;;  %vm1009_vm14 = vmor %vm1007_vm7, %vm1008_vm11  ;;  %v1120_v36 = vsel %vm2589_vm3, %v1119_v41, %v1115_v25 }
 0x12e   : > { %v1144_v43 = vmul.f32 %v775_v11, %v2463_v42  ;;  %v1125_v32 = vmul.f32 %v1663_v50, %v1124_v28  ;;  %v1014_v42 = vor.u32 1.1754944e-38, %v1013_v54  ;;  %vm1129_vm1 = vmor %vm1127_vm15, %vm1128_vm12  ;;  %v1134_v48 = vor.u32 1.1754944e-38, %v1133_v40 }
 0x12f   : > { %v890_v23 = vsel %vm889_vm10, %v1659_v33, %v886_v51  ;;  %v1006_v13 = vadd.f32 %v1661_v44, %v1005_v39  ;;  %vm1132_vm0 = vcmp.eq.f32.partialorder %v1131_v27, 8.507059e+37  ;;  %v1167_v53 = vmul.f32 %v1120_v36, %v2460_v62 }
 0x130   : > { %v895_v21 = vsel %vm2584_vm2, %v894_v8, %v890_v23  ;;  %v1446_v14 = vpack.c.bf16 %v1144_v43, %v2544_v20  ;;  %v1126_v45 = vadd.f32 %v1663_v50, %v1125_v32  ;;  %v1159_v20 = vmul.f32 %v1000_v49, %v2426_v46 }
 0x131   : > { %v1152_v26 = vmul.f32 %v895_v21, %v2475_v9  ;;  %v1010_v5 = vsel %vm1009_vm14, %v1661_v44, %v1006_v13 }
 0x132   : > { %1510 = vst [vmem:[%s1963_s30 + $0x18] sm:$0xff] %v1446_v14   ;;  %v1015_v52 = vsel %vm1012_vm13, %v1014_v42, %v1010_v5  ;;  %v1130_v63 = vsel %vm1129_vm1, %v1663_v50, %v1126_v45 }
 0x133   : > { %v1466_v9 = vpack.c.bf16 %v1152_v26, %v2565_v17  ;;  %v1160_v2 = vmul.f32 %v1015_v52, %v2486_v1  ;;  %v1135_v35 = vsel %vm1132_vm0, %v1134_v48, %v1130_v63 }
 0x134   : > { %v1168_v56 = vmul.f32 %v1135_v35, %v2489_v18 }
 0x135   : > { %1514 = vst [vmem:[%s1963_s30 + $0x38] sm:$0xff] %v1466_v9   ;;  %v1486_v57 = vpack.c.bf16 %v1160_v2, %v1159_v20 }
 0x136   : > { %v1506_v33 = vpack.c.bf16 %v1168_v56, %v1167_v53 }
 0x137   : > { %1518 = vst [vmem:[%s1963_s30 + $0x58] sm:$0xff] %v1486_v57  }
 0x138   : > { %1522 = vst [vmem:[%s1963_s30 + $0x78] sm:$0xff] %v1506_v33  }
 0x139 PF: > { %s14_s15 = sadd.s32 1, %s1672_s15  }
 0x13a   : > { %p11_p4 = scmp.ge.s32.totalorder %s14_s15, 4  }
 0x13c   :  { %13 = sbr.rel (!%p11_p4) target bundleno = 1 (0x1), region = 66 }

</bundles_post_ra>
